<compile_context>
chip_gen: v5e
topology: v5e:2x2
jax: 0.10.0
libtpu: 0.0.40
codegen_flags: <defaults>
</compile_context>

<pallas_src>
import functools

import jax
import jax.numpy as jnp
import numpy as np
from jax.experimental import pallas as pl
from jax.experimental.pallas import tpu as pltpu


def _round_up(x, m):
    return ((x + m - 1) // m) * m


def _focal_loss_kernel(logits_ref, tgt_ref, *rest, gamma, s_total, tile_s,
                       masked, use_alpha):
    if use_alpha:
        at_ref, out_ref = rest
    else:
        (out_ref,) = rest
        at_ref = None

    x = logits_ref[...].astype(jnp.float32)              # (bn, C, TS)
    tgt = tgt_ref[...]                                    # (bn, 1, TS) int32

    # log-softmax over the class (sublane) axis.
    m = jnp.max(x, axis=1, keepdims=True)                 # (bn, 1, TS)
    z = x - m
    lse = jnp.log(jnp.sum(jnp.exp(z), axis=1, keepdims=True))

    # Gather of the target-class logit: direct select + sublane reduce
    # (no int->f32 cast, no one-hot multiply).
    cls = jax.lax.broadcasted_iota(jnp.int32, x.shape, 1)
    z_t = jnp.sum(jnp.where(cls == tgt, z, 0.0), axis=1, keepdims=True)
    logpt = z_t - lse                                      # (bn, 1, TS)
    pt = jnp.exp(logpt)

    # Per-element alpha weight precomputed in the wrapper (alpha[target]).
    logpt_w = logpt * at_ref[...] if use_alpha else logpt

    # Focal factor, specialized at trace time.
    if gamma == 0.0:
        loss = -logpt_w
    else:
        omp = jnp.maximum(1.0 - pt, 0.0)                   # NaN guard for pt>1
        g_int = int(gamma)
        if float(g_int) == float(gamma) and 1 <= g_int <= 8:
            focal = omp
            for _ in range(g_int - 1):                     # VALU muls, no pow
                focal = focal * omp
        else:
            focal = omp ** jnp.float32(gamma)              # EUP fallback
        loss = -focal * logpt_w

    # Ragged spatial tail: mask only the tiny (bn,1,TS) loss row, and only
    # when S is not a multiple of tile_s (trace-time).  Reductions above are
    # per-lane and select() does not propagate NaN from unselected garbage,
    # so masking the loss row alone is sufficient.
    if masked:
        j = pl.program_id(1)
        lane = jax.lax.broadcasted_iota(jnp.int32, (1, 1, tile_s), 2)
        valid = (lane + j * tile_s) < s_total
        loss = jnp.where(valid, loss, 0.0)

    row = jnp.sum(loss, axis=0)                            # (1, TS)
    out_ref[...] = jnp.sum(row, axis=1, keepdims=True)     # (1, 1) partial sum


def focal_loss(logits, target, *, gamma=0.0, alpha=None, size_average=True,
               max_tile_s=65536):
    """JAX/Pallas equivalent of FocalLoss.forward.

    logits: (N, C, *spatial) float array (class axis = 1, like PyTorch NCHW),
            or already-flattened (R, C).  f32 or bf16 (bf16 recommended for
            HBM-bandwidth-bound chips like v5e; math is f32 in-kernel).
    target: integer class indices, (N, *spatial) or (R,).
    """
    if logits.ndim > 2:
        n, c = logits.shape[0], logits.shape[1]
        x = logits.reshape(n, c, -1)                       # (N, C, S) free view
        tgt = target.reshape(n, 1, -1).astype(jnp.int32)   # (N, 1, S) free view
    else:
        # 2-D rows x classes path: one wrapper transpose puts classes on
        # sublanes / rows on lanes (a single extra HBM pass; cold path).
        c = logits.shape[1]
        n = 1
        x = logits.T.reshape(1, c, -1)                     # (1, C, R)
        tgt = target.reshape(1, 1, -1).astype(jnp.int32)   # (1, 1, R)

    s = x.shape[2]
    r_total = n * s

    # Per-element alpha weight, gathered once in the wrapper (removes a full
    # (C, TS) select + reduce pass from every kernel step; cost independent
    # of C).
    use_alpha = alpha is not None
    if use_alpha:
        if isinstance(alpha, (float, int)):
            # matches PyTorch: torch.Tensor([alpha, 1 - alpha]) (binary case)
            alpha_vec = jnp.array([float(alpha), 1.0 - float(alpha)],
                                  jnp.float32)
        else:
            alpha_vec = jnp.asarray(alpha, dtype=jnp.float32).reshape(-1)
        if alpha_vec.shape[0] < c:
            # NOTE: zero-pads missing classes (PyTorch's gather would raise).
            alpha_vec = jnp.pad(alpha_vec, (0, c - alpha_vec.shape[0]))
        at_arr = alpha_vec[:c][tgt]                        # (N, 1, S) f32

    # Per-grid-step VMEM footprint model: double-buffered logits tile in its
    # HBM dtype plus ~5 f32 (bn, C, TS)-shaped temporaries (cast, z, exp(z),
    # class iota, gather select).  Budget ~20 MiB of working set under an
    # explicit 32 MiB scoped limit (covers v5e's 16 MiB default, safe on
    # v6e/v7x).
    itemsize = jnp.dtype(x.dtype).itemsize
    bytes_per_elem = 2 * itemsize + 5 * 4
    vmem_budget = 20 * 1024 * 1024
    max_block_elems = max(c * 128, vmem_budget // bytes_per_elem)

    # Lane-dense spatial tile: as large as possible (>= ~1-2 MiB of logits per
    # step) so the ~0.35 us fixed per-step overhead is amortized.
    tile_s = min(_round_up(s, 128), max_tile_s,
                 max(128, (max_block_elems // c) // 128 * 128))
    grid_s = pl.cdiv(s, tile_s)

    # Batch blocking: when the whole spatial extent fits in one tile, pack
    # several images per grid step (largest divisor of N within budget, so no
    # batch-tail masking is needed).
    bn = 1
    if grid_s == 1 and n > 1:
        bn_cap = max(1, max_block_elems // (c * tile_s))
        for d in range(min(n, bn_cap), 0, -1):
            if n % d == 0:
                bn = d
                break
    grid_n = n // bn
    masked = (s % tile_s) != 0

    kernel = functools.partial(
        _focal_loss_kernel, gamma=float(gamma), s_total=s, tile_s=tile_s,
        masked=masked, use_alpha=use_alpha)

    in_specs = [
        # logits: (bn, C, tile_s) lane-dense block, classes on sublanes.
        pl.BlockSpec((bn, c, tile_s), lambda i, j: (i, 0, j)),
        # targets: (bn, 1, tile_s) lane-dense block.
        pl.BlockSpec((bn, 1, tile_s), lambda i, j: (i, 0, j)),
    ]
    args = [x, tgt]
    if use_alpha:
        in_specs.append(pl.BlockSpec((bn, 1, tile_s), lambda i, j: (i, 0, j)))
        args.append(at_arr)

    partials = pl.pallas_call(
        kernel,
        out_shape=jax.ShapeDtypeStruct((grid_n, grid_s, 1, 1), jnp.float32),
        grid_spec=pltpu.PrefetchScalarGridSpec(
            num_scalar_prefetch=0,
            grid=(grid_n, grid_s),
            in_specs=in_specs,
            out_specs=pl.BlockSpec((None, None, 1, 1),
                                   lambda i, j: (i, j, 0, 0)),
        ),
        compiler_params=pltpu.CompilerParams(
            dimension_semantics=("parallel", "parallel"),
            vmem_limit_bytes=32 * 1024 * 1024),
    )(*args)

    total = jnp.sum(partials)
    if size_average:
        total = total / jnp.float32(r_total)
    return total


def _focal_loss_ref(logits, target, *, gamma=0.0, alpha=None,
                    size_average=True):
    """Pure-JAX reference mirroring the PyTorch forward (f32 math)."""
    if logits.ndim > 2:
        n, c = logits.shape[0], logits.shape[1]
        x = jnp.transpose(logits.reshape(n, c, -1), (0, 2, 1)).reshape(-1, c)
    else:
        x = logits
        c = x.shape[1]
    t = target.reshape(-1).astype(jnp.int32)
    logp = jax.nn.log_softmax(x.astype(jnp.float32), axis=1)
    logpt = jnp.take_along_axis(logp, t[:, None], axis=1)[:, 0]
    pt = jnp.exp(logpt)
    if alpha is not None:
        if isinstance(alpha, (float, int)):
            a = jnp.array([float(alpha), 1.0 - float(alpha)], jnp.float32)
        else:
            a = jnp.asarray(alpha, jnp.float32)
        logpt = logpt * a[t]
    loss = -1.0 * (1.0 - pt) ** gamma * logpt
    return loss.mean() if size_average else loss.sum()


if __name__ == "__main__":
    key = jax.random.PRNGKey(0)
    k1, k2, k3, k4 = jax.random.split(key, 4)

    # 1) NCHW, per-class alpha, gamma=2 (integer fast path), mean.
    N, C, H, W = 2, 4, 16, 16
    logits = jax.random.normal(k1, (N, C, H, W), dtype=jnp.float32)
    target = jax.random.randint(k2, (N, H, W), 0, C, dtype=jnp.int32)
    alpha = [0.1, 0.2, 0.3, 0.4]

    out = jax.block_until_ready(
        focal_loss(logits, target, gamma=2.0, alpha=alpha, size_average=True))
    ref = _focal_loss_ref(logits, target, gamma=2.0, alpha=alpha,
                          size_average=True)
    np.testing.assert_allclose(np.asarray(out), np.asarray(ref),
                               rtol=1e-5, atol=1e-6)

    # 2) no alpha / gamma=0 / sum.
    out2 = jax.block_until_ready(
        focal_loss(logits, target, gamma=0.0, alpha=None, size_average=False))
    ref2 = _focal_loss_ref(logits, target, gamma=0.0, alpha=None,
                           size_average=False)
    np.testing.assert_allclose(np.asarray(out2), np.asarray(ref2),
                               rtol=1e-5, atol=1e-5)

    # 3) ragged spatial size (not a multiple of 128) + non-integer gamma.
    logits3 = jax.random.normal(k3, (2, 4, 15, 15), dtype=jnp.float32)
    target3 = jax.random.randint(k4, (2, 15, 15), 0, 4, dtype=jnp.int32)
    out3 = jax.block_until_ready(
        focal_loss(logits3, target3, gamma=1.5, alpha=None, size_average=True))
    ref3 = _focal_loss_ref(logits3, target3, gamma=1.5, alpha=None,
                           size_average=True)
    np.testing.assert_allclose(np.asarray(out3), np.asarray(ref3),
                               rtol=1e-5, atol=1e-6)

    # 4) bf16 logits in HBM (halves dominant DMA traffic); f32 math in-kernel.
    logits_bf16 = logits.astype(jnp.bfloat16)
    out4 = jax.block_until_ready(
        focal_loss(logits_bf16, target, gamma=2.0, alpha=alpha,
                   size_average=True))
    ref4 = _focal_loss_ref(logits_bf16, target, gamma=2.0, alpha=alpha,
                           size_average=True)
    np.testing.assert_allclose(np.asarray(out4), np.asarray(ref4),
                               rtol=1e-4, atol=1e-5)

    # 5) already-flattened 2-D (rows x classes) input path.
    logits5 = jax.random.normal(k3, (100, 4), dtype=jnp.float32)
    target5 = jax.random.randint(k4, (100,), 0, 4, dtype=jnp.int32)
    out5 = jax.block_until_ready(
        focal_loss(logits5, target5, gamma=2.0, alpha=alpha,
                   size_average=True))
    ref5 = _focal_loss_ref(logits5, target5, gamma=2.0, alpha=alpha,
                           size_average=True)
    np.testing.assert_allclose(np.asarray(out5), np.asarray(ref5),
                               rtol=1e-5, atol=1e-6)

    print("KERNEL_OK")
</pallas_src>

<mosaic_0001>
module attributes {stable_mosaic.version = 11 : i64} {
  func.func @_focal_loss_kernel(%arg0: i32, %arg1: i32, %arg2: memref<2x4x256xf32, #tpu.memory_space<vmem>>, %arg3: memref<2x1x256xi32, #tpu.memory_space<vmem>>, %arg4: memref<2x1x256xf32, #tpu.memory_space<vmem>>, %arg5: memref<1x1x1x1xf32, #tpu.memory_space<vmem>>) attributes {dimension_semantics = [#tpu.dimension_semantics<parallel>, #tpu.dimension_semantics<parallel>], iteration_bounds = array<i64: 1, 1>, scalar_prefetch = 0 : i64, scratch_operands = 0 : i64, tpu.core_type = #tpu.core_type<tc>, window_params = [{transform_indices = @transform_0, window_bounds = array<i64: 2, 4, 256>}, {transform_indices = @transform_1, window_bounds = array<i64: 2, 1, 256>}, {transform_indices = @transform_2, window_bounds = array<i64: 2, 1, 256>}, {transform_indices = @transform_3, window_bounds = array<i64: 1, 1, 1, 1>}]} {
    %c0 = arith.constant 0 : index
    %c0_0 = arith.constant 0 : index
    %c0_1 = arith.constant 0 : index
    %0 = vector.load %arg2[%c0, %c0_0, %c0_1] : memref<2x4x256xf32, #tpu.memory_space<vmem>>, vector<2x4x256xf32>
    %c0_2 = arith.constant 0 : index
    %c0_3 = arith.constant 0 : index
    %c0_4 = arith.constant 0 : index
    %1 = vector.load %arg3[%c0_2, %c0_3, %c0_4] : memref<2x1x256xi32, #tpu.memory_space<vmem>>, vector<2x1x256xi32>
    %cst = arith.constant dense<0xFF800000> : vector<2x256xf32>
    %2 = vector.multi_reduction <maximumf>, %0, %cst [1] : vector<2x4x256xf32> to vector<2x256xf32>
    %3 = vector.shape_cast %2 : vector<2x256xf32> to vector<2x1x256xf32>
    %4 = vector.broadcast %3 : vector<2x1x256xf32> to vector<2x4x256xf32>
    %5 = arith.subf %0, %4 : vector<2x4x256xf32>
    %6 = math.exp %5 : vector<2x4x256xf32>
    %cst_5 = arith.constant dense<0.000000e+00> : vector<2x256xf32>
    %7 = vector.multi_reduction <add>, %6, %cst_5 [1] : vector<2x4x256xf32> to vector<2x256xf32>
    %8 = vector.shape_cast %7 : vector<2x256xf32> to vector<2x1x256xf32>
    %9 = math.log %8 : vector<2x1x256xf32>
    %10 = tpu.iota {dimensions = array<i32: 1>} : vector<2x4x256xi32>
    %11 = vector.broadcast %1 : vector<2x1x256xi32> to vector<2x4x256xi32>
    %12 = arith.cmpi eq, %10, %11 : vector<2x4x256xi32>
    %cst_6 = arith.constant 0.000000e+00 : f32
    %13 = vector.broadcast %cst_6 : f32 to vector<2x4x256xf32>
    %14 = arith.select %12, %5, %13 : vector<2x4x256xi1>, vector<2x4x256xf32>
    %cst_7 = arith.constant dense<0.000000e+00> : vector<2x256xf32>
    %15 = vector.multi_reduction <add>, %14, %cst_7 [1] : vector<2x4x256xf32> to vector<2x256xf32>
    %16 = vector.shape_cast %15 : vector<2x256xf32> to vector<2x1x256xf32>
    %17 = arith.subf %16, %9 : vector<2x1x256xf32>
    %18 = math.exp %17 : vector<2x1x256xf32>
    %c0_8 = arith.constant 0 : index
    %c0_9 = arith.constant 0 : index
    %c0_10 = arith.constant 0 : index
    %19 = vector.load %arg4[%c0_8, %c0_9, %c0_10] : memref<2x1x256xf32, #tpu.memory_space<vmem>>, vector<2x1x256xf32>
    %20 = arith.mulf %17, %19 : vector<2x1x256xf32>
    %cst_11 = arith.constant 1.000000e+00 : f32
    %21 = vector.broadcast %cst_11 : f32 to vector<2x1x256xf32>
    %22 = arith.subf %21, %18 : vector<2x1x256xf32>
    %cst_12 = arith.constant 0.000000e+00 : f32
    %23 = vector.broadcast %cst_12 : f32 to vector<2x1x256xf32>
    %24 = arith.maximumf %22, %23 : vector<2x1x256xf32>
    %25 = arith.mulf %24, %24 : vector<2x1x256xf32>
    %cst_13 = arith.constant 0.000000e+00 : f32
    %26 = vector.broadcast %cst_13 : f32 to vector<2x1x256xf32>
    %27 = arith.subf %26, %25 : vector<2x1x256xf32>
    %28 = arith.mulf %27, %20 : vector<2x1x256xf32>
    %cst_14 = arith.constant dense<0.000000e+00> : vector<1x256xf32>
    %29 = vector.multi_reduction <add>, %28, %cst_14 [0] : vector<2x1x256xf32> to vector<1x256xf32>
    %cst_15 = arith.constant dense<0.000000e+00> : vector<1xf32>
    %30 = vector.multi_reduction <add>, %29, %cst_15 [1] : vector<1x256xf32> to vector<1xf32>
    %31 = vector.shape_cast %30 : vector<1xf32> to vector<1x1xf32>
    %c0_16 = arith.constant 0 : index
    %c0_17 = arith.constant 0 : index
    %c0_18 = arith.constant 0 : index
    %c0_19 = arith.constant 0 : index
    %32 = vector.load %arg5[%c0_16, %c0_17, %c0_18, %c0_19] : memref<1x1x1x1xf32, #tpu.memory_space<vmem>>, vector<1x1x1x1xf32>
    %33 = vector.shape_cast %32 : vector<1x1x1x1xf32> to vector<1x1xf32>
    %34 = vector.shape_cast %31 : vector<1x1xf32> to vector<1x1x1x1xf32>
    tpu.vector_store %arg5[%c0_16, %c0_17, %c0_18, %c0_19], %34 {strides = array<i32>} : memref<1x1x1x1xf32, #tpu.memory_space<vmem>>, vector<1x1x1x1xf32>,
    return
  }
  func.func @transform_0(%arg0: i32, %arg1: i32) -> (i32, i32, i32) {
    %c0_i32 = arith.constant 0 : i32
    %c0_i32_0 = arith.constant 0 : i32
    return %arg0, %c0_i32, %arg1 : i32, i32, i32
  }
  func.func @transform_1(%arg0: i32, %arg1: i32) -> (i32, i32, i32) {
    %c0_i32 = arith.constant 0 : i32
    %c0_i32_0 = arith.constant 0 : i32
    return %arg0, %c0_i32, %arg1 : i32, i32, i32
  }
  func.func @transform_2(%arg0: i32, %arg1: i32) -> (i32, i32, i32) {
    %c0_i32 = arith.constant 0 : i32
    %c0_i32_0 = arith.constant 0 : i32
    return %arg0, %c0_i32, %arg1 : i32, i32, i32
  }
  func.func @transform_3(%arg0: i32, %arg1: i32) -> (i32, i32, i32, i32) {
    %c0_i32 = arith.constant 0 : i32
    %c0_i32_0 = arith.constant 0 : i32
    %c0_i32_1 = arith.constant 0 : i32
    return %arg0, %arg1, %c0_i32, %c0_i32_0 : i32, i32, i32, i32
  }
}

</mosaic_0001>

<bundles_post_ra>
// kernel: tpu_custom_call.1
= control target key start
LH: loop header
LB: loop body
LE: loop exit
PB: predicated region body
PF: predicated region fallthrough
CT: control target
= control target key end

     0   :  { %8 = vsyncpa [#allocation3], 0  ;;  %s516_s0 = inlined_call_operand.hbm [shape: f32[2,4,256], index: 0, kind: input, shape index: {}]   ;;  %s517_s1 = inlined_call_operand.hbm [shape: s32[2,1,256], index: 1, kind: input, shape index: {}]   ;;  %s518_s2 = inlined_call_operand.hbm [shape: f32[2,1,256], index: 2, kind: input, shape index: {}]   ;;  %s519_s3 = inlined_call_operand.hbm [shape: f32[1,1,1,1], index: 3, kind: output, shape index: {}]  }
   0x1   :  { %9 = vsyncpa [#allocation6], 0  ;;  %s28_s14 = sshll.u32 %s517_s1, 4  ;;  %s29_s14 = int_to_ptr.hbm [resolvable:$true] %s28_s14 }
   0x2   :  { %10 = vsyncpa [#allocation4], 0  ;;  %s438_s15 = smov [#allocation5]   ;;  %s15_s19 = sshll.u32 %s516_s0, 4  ;;  %s16_s19 = int_to_ptr.hbm [resolvable:$true] %s15_s19 }
   0x3   :  { %s30_s16 = sshll.u32 %s438_s15, 4  ;;  %s439_s20 = smov 32   ;;  %s31_s16 = int_to_ptr.vmem [resolvable:$true] %s30_s16 }
   0x4   :  { %s440_s21 = smov 2   ;;  %s441_s22 = smov [#allocation2]  }
   0x5   :  { %36 = dma.hbm_to_vmem [thread:$0]  %s29_s14, 64, %s31_s16, [#allocation6], %s439_s20, %s439_s20, %s440_s21  }
   0x6   :  { %s17_s23 = sshll.u32 %s441_s22, 4  ;;  %s442_s24 = smov 128   ;;  %s18_s23 = int_to_ptr.vmem [resolvable:$true] %s17_s23 }
   0x7   :  { %s443_s25 = smov 8   ;;  %s41_s27 = sshll.u32 %s518_s2, 4  ;;  %s42_s27 = int_to_ptr.hbm [resolvable:$true] %s41_s27 }
   0x8   :  { %23 = dma.hbm_to_vmem [thread:$0]  %s16_s19, 256, %s18_s23, [#allocation3], %s442_s24, %s442_s24, %s443_s25  }
   0x9   :  { %s444_s28 = smov [#allocation7]  }
   0xa   :  { %s43_s29 = sshll.u32 %s444_s28, 4  ;;  %s44_s29 = int_to_ptr.vmem [resolvable:$true] %s43_s29 }
   0xb   :  { %49 = dma.hbm_to_vmem [thread:$0]  %s42_s27, 64, %s44_s29, [#allocation6], %s439_s20, %s439_s20, %s440_s21  }
   0xc   :  { %432 = dma.done.wait [#allocation3], 256  }
   0xd   :  { %433 = vsyncadd [#allocation3], 4294967040 }
   0xe   :  { %434 = dma.done.wait [#allocation6], 128  }
   0xf   :  { %435 = vsyncadd [#allocation6], 4294967168  ;;  %v62_v0 = vld [vmem:[#allocation2] sm:$0xff]  ;;  %v63_v1 = vld [vmem:[#allocation2 + $0x8] sm:$0xff]  ;;  %vm79_vm0 = vcmask 1043456   ;;  %v173_v44 = vlaneseq  ;;  %vm276_vm5 = vcmask 1040384  }
  0x10   :  { %68 = vst [vmem:[#allocation1] ss:$2 sm:$0xff] %v62_v0  ;;  %v64_v45 = vld [vmem:[#allocation5] sm:$0x3]  ;;  %v65_v46 = vld [vmem:[#allocation5 + $0x2] sm:$0x3] }
  0x11   :  { %72 = vst [vmem:[#allocation1 + $0x10] ss:$2 sm:$0xff] %v63_v1  ;;  %v174_v47 = vshrl.u32 %v173_v44, 7  ;;  %v175_v60 = vperm.slane %v64_v45, 0  ;;  %v176_v61 = vperm.slane %v64_v45, 1  ;;  %v177_v62 = vperm.slane %v65_v46, 0 }
  0x12   :  { %v178_v63 = vperm.slane %v65_v46, 1  ;;  %s445_s0 = smov [#allocation8]   ;;  %s297_s5 = sshll.u32 %s519_s3, 4  ;;  %vm288_vm6 = vcmask 0   ;;  %s298_s5 = int_to_ptr.hbm [resolvable:$true] %s297_s5 }
  0x13   :  { %vm485_vm1 = vcmp.eq.s32.totalorder %v174_v47, %v175_v60  ;;  %vm489_vm2 = vcmp.eq.s32.totalorder %v174_v47, %v176_v61  ;;  %vm493_vm3 = vcmp.eq.s32.totalorder %v174_v47, %v177_v62  ;;  %s295_s2 = sshll.u32 %s445_s0, 4  ;;  %s296_s2 = int_to_ptr.vmem [resolvable:$true] %s295_s2 }
  0x14   :  { %vm497_vm4 = vcmp.eq.s32.totalorder %v174_v47, %v178_v63 }
  0x17   :  { %v69_v2 = vld.sshfl [vmem:[#allocation1] sm:$0xff pattern:$0x75316420]  ;;  %v70_v3 = vld.sshfl [vmem:[#allocation1 + $0x8] sm:$0xff pattern:$0x75316420] }
  0x18   :  { %v73_v4 = vld.sshfl [vmem:[#allocation1 + $0x10] sm:$0xff pattern:$0x75316420]  ;;  %v74_v5 = vld.sshfl [vmem:[#allocation1 + $0x18] sm:$0xff pattern:$0x75316420] }
  0x19   :  { %v80_v6 = vsel %vm79_vm0, %v69_v2, -inf  ;;  %v87_v7 = vsel %vm79_vm0, %v70_v3, -inf  ;;  %v94_v8 = vsel %vm79_vm0, %v73_v4, -inf  ;;  %v101_v9 = vsel %vm79_vm0, %v74_v5, -inf }
  0x1a   :  { %v81_v10 = vrot.slane %v80_v6, 4  ;;  %v88_v11 = vrot.slane %v87_v7, 4  ;;  %v95_v12 = vrot.slane %v94_v8, 4  ;;  %v102_v13 = vrot.slane %v101_v9, 4 }
  0x1c   :  { %v82_v14 = vmax.f32 %v80_v6, %v81_v10  ;;  %v89_v15 = vmax.f32 %v87_v7, %v88_v11  ;;  %v96_v16 = vmax.f32 %v94_v8, %v95_v12  ;;  %v103_v17 = vmax.f32 %v101_v9, %v102_v13 }
  0x1e   :  { %v83_v18 = vrot.slane %v82_v14, 2  ;;  %v90_v19 = vrot.slane %v89_v15, 2  ;;  %v97_v20 = vrot.slane %v96_v16, 2  ;;  %v104_v21 = vrot.slane %v103_v17, 2 }
  0x20   :  { %v84_v22 = vmax.f32 %v82_v14, %v83_v18  ;;  %v91_v23 = vmax.f32 %v89_v15, %v90_v19  ;;  %v98_v24 = vmax.f32 %v96_v16, %v97_v20  ;;  %v105_v25 = vmax.f32 %v103_v17, %v104_v21 }
  0x22   :  { %v85_v26 = vrot.slane %v84_v22, 1  ;;  %v92_v27 = vrot.slane %v91_v23, 1  ;;  %v99_v28 = vrot.slane %v98_v24, 1  ;;  %v106_v29 = vrot.slane %v105_v25, 1 }
  0x24   :  { %v86_v30 = vmax.f32 %v84_v22, %v85_v26  ;;  %v93_v31 = vmax.f32 %v91_v23, %v92_v27  ;;  %v100_v32 = vmax.f32 %v98_v24, %v99_v28  ;;  %v107_v33 = vmax.f32 %v105_v25, %v106_v29 }
  0x26   :  { %v112_v34 = vrot.slane %v93_v31, 4  ;;  %v113_v35 = vrot.slane %v107_v33, 4 }
  0x28   :  { %v114_v36 = vsel %vm79_vm0, %v86_v30, %v112_v34  ;;  %v115_v37 = vsel %vm79_vm0, %v100_v32, %v113_v35 }
  0x29   :  { %v118_v38 = vsub.f32 %v62_v0, %v114_v36  ;;  %v119_v39 = vsub.f32 %v63_v1, %v115_v37 }
  0x2b   :  { %v120_v40 = vmul.f32 1.442695, %v118_v38  ;;  %v122_v41 = vmul.f32 1.442695, %v119_v39 }
  0x2d   :  { %316 = vpow2.f32 %v120_v40 }
  0x2e   :  { %318 = vpow2.f32 %v122_v41 }
  0x33   :  { %v317_v42 = vpop.eup %316 }
  0x34   :  { %v319_v43 = vpop.eup %318  ;;  %126 = vst [vmem:[#allocation1] ss:$2 sm:$0xff] %v317_v42 }
  0x35   :  { %130 = vst [vmem:[#allocation1 + $0x10] ss:$2 sm:$0xff] %v319_v43 }
  0x3b   :  { %v127_v48 = vld.sshfl [vmem:[#allocation1] sm:$0xff pattern:$0x75316420]  ;;  %v128_v49 = vld.sshfl [vmem:[#allocation1 + $0x8] sm:$0xff pattern:$0x75316420] }
  0x3c   :  { %v131_v50 = vld.sshfl [vmem:[#allocation1 + $0x10] sm:$0xff pattern:$0x75316420]  ;;  %v132_v51 = vld.sshfl [vmem:[#allocation1 + $0x18] sm:$0xff pattern:$0x75316420] }
  0x3d   :  { %v137_v52 = vsel %vm79_vm0, %v127_v48, 0.0  ;;  %v144_v53 = vsel %vm79_vm0, %v128_v49, 0.0  ;;  %v151_v54 = vsel %vm79_vm0, %v131_v50, 0.0  ;;  %v158_v55 = vsel %vm79_vm0, %v132_v51, 0.0  ;;  %185 = vst [vmem:[#allocation1] ss:$2 sm:$0xff] %v118_v38 }
  0x3e   :  { %v138_v56 = vrot.slane %v137_v52, 4  ;;  %v145_v57 = vrot.slane %v144_v53, 4  ;;  %v152_v58 = vrot.slane %v151_v54, 4  ;;  %v159_v59 = vrot.slane %v158_v55, 4  ;;  %189 = vst [vmem:[#allocation1 + $0x10] ss:$2 sm:$0xff] %v119_v39 }
  0x40   :  { %v139_v0 = vadd.f32 %v138_v56, %v137_v52  ;;  %v146_v1 = vadd.f32 %v145_v57, %v144_v53  ;;  %v153_v2 = vadd.f32 %v152_v58, %v151_v54  ;;  %v160_v3 = vadd.f32 %v159_v59, %v158_v55 }
  0x42   :  { %v140_v4 = vrot.slane %v139_v0, 2  ;;  %v147_v5 = vrot.slane %v146_v1, 2  ;;  %v154_v6 = vrot.slane %v153_v2, 2  ;;  %v161_v7 = vrot.slane %v160_v3, 2 }
  0x44   :  { %v141_v12 = vadd.f32 %v140_v4, %v139_v0  ;;  %v148_v13 = vadd.f32 %v147_v5, %v146_v1  ;;  %v155_v14 = vadd.f32 %v154_v6, %v153_v2  ;;  %v162_v15 = vadd.f32 %v161_v7, %v160_v3  ;;  %v186_v16 = vld.sshfl [vmem:[#allocation1] sm:$0xff pattern:$0x75316420]  ;;  %v187_v17 = vld.sshfl [vmem:[#allocation1 + $0x8] sm:$0xff pattern:$0x75316420] }
  0x45   :  { %v190_v18 = vld.sshfl [vmem:[#allocation1 + $0x10] sm:$0xff pattern:$0x75316420]  ;;  %v191_v19 = vld.sshfl [vmem:[#allocation1 + $0x18] sm:$0xff pattern:$0x75316420] }
  0x46   :  { %v142_v20 = vrot.slane %v141_v12, 1  ;;  %v149_v21 = vrot.slane %v148_v13, 1  ;;  %v156_v22 = vrot.slane %v155_v14, 1  ;;  %v163_v23 = vrot.slane %v162_v15, 1 }
  0x47   :  { %v196_v24 = vsel %vm485_vm1, %v186_v16, 0.0  ;;  %v197_v25 = vsel %vm489_vm2, %v187_v17, 0.0  ;;  %v198_v26 = vsel %vm493_vm3, %v190_v18, 0.0  ;;  %v199_v27 = vsel %vm497_vm4, %v191_v19, 0.0 }
  0x48   :  { %v143_v28 = vadd.f32 %v142_v20, %v141_v12  ;;  %v150_v29 = vadd.f32 %v149_v21, %v148_v13  ;;  %v157_v30 = vadd.f32 %v156_v22, %v155_v14  ;;  %v164_v31 = vadd.f32 %v163_v23, %v162_v15  ;;  %v240_v12 = vld [vmem:[#allocation7] sm:$0x3]  ;;  %v241_v14 = vld [vmem:[#allocation7 + $0x2] sm:$0x3] }
  0x49   :  { %v200_v32 = vsel %vm79_vm0, %v196_v24, 0.0  ;;  %v207_v33 = vsel %vm79_vm0, %v197_v25, 0.0  ;;  %v214_v34 = vsel %vm79_vm0, %v198_v26, 0.0  ;;  %v221_v35 = vsel %vm79_vm0, %v199_v27, 0.0 }
  0x4a   :  { %320 = vlog2.f32 %v143_v28  ;;  %v201_v36 = vrot.slane %v200_v32, 4  ;;  %v208_v37 = vrot.slane %v207_v33, 4  ;;  %v215_v38 = vrot.slane %v214_v34, 4 }
  0x4b   :  { %322 = vlog2.f32 %v150_v29  ;;  %v222_v39 = vrot.slane %v221_v35, 4  ;;  %v244_v16 = vperm.slane %v240_v12, 0  ;;  %v245_v19 = vperm.slane %v240_v12, 1 }
  0x4c   :  { %324 = vlog2.f32 %v157_v30  ;;  %v202_v40 = vadd.f32 %v201_v36, %v200_v32  ;;  %v209_v41 = vadd.f32 %v208_v37, %v207_v33  ;;  %v216_v42 = vadd.f32 %v215_v38, %v214_v34 }
  0x4d   :  { %326 = vlog2.f32 %v164_v31  ;;  %v223_v43 = vadd.f32 %v222_v39, %v221_v35  ;;  %v246_v22 = vperm.slane %v241_v14, 0  ;;  %v247_v25 = vperm.slane %v241_v14, 1 }
  0x4e   :  { %v203_v44 = vrot.slane %v202_v40, 2  ;;  %v210_v45 = vrot.slane %v209_v41, 2  ;;  %v217_v46 = vrot.slane %v216_v42, 2 }
  0x4f   :  { %v224_v47 = vrot.slane %v223_v43, 2 }
  0x50   :  { %v321_v48 = vpop.eup %320  ;;  %v204_v49 = vadd.f32 %v203_v44, %v202_v40  ;;  %v211_v50 = vadd.f32 %v210_v45, %v209_v41  ;;  %v218_v51 = vadd.f32 %v217_v46, %v216_v42 }
  0x51   :  { %v323_v52 = vpop.eup %322  ;;  %v166_v53 = vmul.f32 0.6931472, %v321_v48  ;;  %v225_v54 = vadd.f32 %v224_v47, %v223_v43 }
  0x52   :  { %v325_v55 = vpop.eup %324  ;;  %v168_v56 = vmul.f32 0.6931472, %v323_v52  ;;  %v205_v57 = vrot.slane %v204_v49, 1  ;;  %v212_v58 = vrot.slane %v211_v50, 1  ;;  %v219_v59 = vrot.slane %v218_v51, 1 }
  0x53   :  { %v327_v60 = vpop.eup %326  ;;  %v170_v61 = vmul.f32 0.6931472, %v325_v55  ;;  %v226_v62 = vrot.slane %v225_v54, 1 }
  0x54   :  { %v172_v63 = vmul.f32 0.6931472, %v327_v60  ;;  %v206_v0 = vadd.f32 %v205_v57, %v204_v49  ;;  %v213_v1 = vadd.f32 %v212_v58, %v211_v50  ;;  %v220_v2 = vadd.f32 %v219_v59, %v218_v51 }
  0x55   :  { %v227_v3 = vadd.f32 %v226_v62, %v225_v54 }
  0x56   :  { %v228_v4 = vsub.f32 %v206_v0, %v166_v53  ;;  %v229_v5 = vsub.f32 %v213_v1, %v168_v56  ;;  %v230_v6 = vsub.f32 %v220_v2, %v170_v61 }
  0x57   :  { %v231_v7 = vsub.f32 %v227_v3, %v172_v63 }
  0x58   :  { %v232_v8 = vmul.f32 1.442695, %v228_v4  ;;  %v234_v9 = vmul.f32 1.442695, %v229_v5  ;;  %v236_v10 = vmul.f32 1.442695, %v230_v6  ;;  %v252_v28 = vmul.f32 %v244_v16, %v228_v4 }
  0x59   :  { %v238_v11 = vmul.f32 1.442695, %v231_v7  ;;  %v253_v31 = vmul.f32 %v245_v19, %v229_v5  ;;  %v254_v34 = vmul.f32 %v246_v22, %v230_v6  ;;  %v255_v37 = vmul.f32 %v247_v25, %v231_v7 }
  0x5a   :  { %328 = vpow2.f32 %v232_v8 }
  0x5b   :  { %330 = vpow2.f32 %v234_v9 }
  0x5c   :  { %332 = vpow2.f32 %v236_v10 }
  0x5d   :  { %334 = vpow2.f32 %v238_v11 }
  0x60   :  { %v329_v13 = vpop.eup %328 }
  0x61   :  { %v331_v15 = vpop.eup %330  ;;  %v256_v17 = vsub.f32 1.0, %v329_v13 }
  0x62   :  { %v333_v18 = vpop.eup %332  ;;  %v257_v20 = vsub.f32 1.0, %v331_v15 }
  0x63   :  { %v335_v21 = vpop.eup %334  ;;  %v258_v23 = vsub.f32 1.0, %v333_v18  ;;  %v260_v24 = vmax.f32 %v256_v17, 0.0 }
  0x64   :  { %v259_v26 = vsub.f32 1.0, %v335_v21  ;;  %v261_v27 = vmax.f32 %v257_v20, 0.0 }
  0x65   :  { %v262_v29 = vmax.f32 %v258_v23, 0.0  ;;  %v264_v30 = vmul.f32 %v260_v24, %v260_v24 }
  0x66   :  { %v263_v32 = vmax.f32 %v259_v26, 0.0  ;;  %v265_v33 = vmul.f32 %v261_v27, %v261_v27 }
  0x67   :  { %v266_v35 = vmul.f32 %v262_v29, %v262_v29  ;;  %v268_v36 = vsub.f32 0.0, %v264_v30 }
  0x68   :  { %v267_v38 = vmul.f32 %v263_v32, %v263_v32  ;;  %v269_v39 = vsub.f32 0.0, %v265_v33 }
  0x69   :  { %v270_v40 = vsub.f32 0.0, %v266_v35  ;;  %v272_v41 = vmul.f32 %v268_v36, %v252_v28 }
  0x6a   :  { %v271_v42 = vsub.f32 0.0, %v267_v38  ;;  %v273_v43 = vmul.f32 %v269_v39, %v253_v31 }
  0x6b   :  { %v274_v44 = vmul.f32 %v270_v40, %v254_v34  ;;  %v277_v45 = vsel %vm276_vm5, %v272_v41, 0.0 }
  0x6c   :  { %v275_v46 = vmul.f32 %v271_v42, %v255_v37  ;;  %v280_v47 = vsel %vm276_vm5, %v273_v43, 0.0 }
  0x6d   :  { %v278_v48 = vsel %vm276_vm5, %v274_v44, 0.0 }
  0x6e   :  { %v279_v49 = vadd.f32 %v278_v48, %v277_v45  ;;  %v281_v50 = vsel %vm276_vm5, %v275_v46, 0.0 }
  0x6f   :  { %v282_v51 = vadd.f32 %v281_v50, %v280_v47 }
  0x70   :  { %v283_v52 = vsel %vm276_vm5, %v279_v49, 0.0 }
  0x71   :  { %v284_v53 = vsel %vm276_vm5, %v282_v51, 0.0 }
  0x72   :  { %v285_v54 = vadd.f32 %v284_v53, %v283_v52 }
  0x74   :  { %286 = vadd.xlane.f32.xlu0 %v285_v54 }
  0xe7   :  { %v287_v55 = vpop.xlane.xlu0 %286 }
  0xe8   :  { %289 = vst.msk [vmem:[#allocation8] sm:$0x1] %vm288_vm6, %v287_v55 }
  0xe9   :  { %300 = dma.vmem_to_hbm [thread:$0]  %s296_s2, 16, %s298_s5, [#allocation4]  }
  0xea   :  { %436 = dma.done.wait [#allocation4], 16  }
  0xeb   :  { %437 = vsyncadd [#allocation4], 4294967280 }
  0xec   :  { %305 = vsyncpa [#allocation3], 1 }
  0xed   :  { %306 = vsyncpa [#allocation6], 1 }
  0xee   :  { %307 = vsyncpa [#allocation4], 1 }

</bundles_post_ra>
